<compile_context>
chip_gen: v7x
topology: tpu7x:2x2x1
jax: 0.10.0
libtpu: 0.0.40
codegen_flags: <defaults>
</compile_context>

<pallas_src>
import jax
import jax.numpy as jnp
from jax.experimental import pallas as pl
from jax.experimental.pallas import tpu as pltpu


def _ceil(a, b):
    return -(-a // b)


def gmz_kernel(x_lin_ref, x_nl_ref, v_ref,
               wa_ref, ba_ref, wb_ref, bb_ref, wc_ref, bc_ref,
               wd_ref, bd_ref, we_ref, be_ref, wf_ref, bf_ref,
               out_ref):
    f32 = jnp.float32
    bf16 = jnp.bfloat16

    # ---- collapsed linear path:  linear_out = sum_c v[c] * x_lin[c, :]
    # (v pre-scaled by `weight`).  VPU multiply + XLU sublane reduction.
    xl = x_lin_ref[...].astype(f32)                                   # (C1, TB)
    linear_out = jnp.sum(xl * v_ref[...], axis=0, keepdims=True)      # (1, TB)

    # ---- 6-layer MLP, feature-major: h is (width, TB), W is (out, in).
    # bf16 matmul operands, f32 accumulation; bias + ReLU in f32 on the VPU.
    h = x_nl_ref[...]                                                 # bf16 (NC, TB)
    h = jax.nn.relu(jnp.dot(wa_ref[...], h,
                            preferred_element_type=f32) + ba_ref[...])
    h = jax.nn.relu(jnp.dot(wb_ref[...], h.astype(bf16),
                            preferred_element_type=f32) + bb_ref[...])
    h = jax.nn.relu(jnp.dot(wc_ref[...], h.astype(bf16),
                            preferred_element_type=f32) + bc_ref[...])
    h = jax.nn.relu(jnp.dot(wd_ref[...], h.astype(bf16),
                            preferred_element_type=f32) + bd_ref[...])
    h = jax.nn.relu(jnp.dot(we_ref[...], h.astype(bf16),
                            preferred_element_type=f32) + be_ref[...])
    # Final 32->1 layer on VPU/XLU; wf/bf pre-scaled by (1 - weight).
    nonlinear_out = (jnp.sum(h * wf_ref[...], axis=0, keepdims=True)
                     + bf_ref[...])                                   # (1, TB)

    out_ref[...] = linear_out + nonlinear_out                         # lane-dense store


def init_params(key, input1, input2):
    ks = jax.random.split(key, 14)
    p = {}
    # depthwise 1x1 conv weights: PyTorch shape (C, 1, 1) -> stored as (1, C)
    p["w1"] = jax.random.normal(ks[0], (1, input1), jnp.float32) * 0.5
    p["w2"] = jax.random.normal(ks[1], (1, input2), jnp.float32) * 0.5
    # layer3_2 MLP: stored as (in, out) so batch-major forward is x @ W + b
    dims = [input2, 32, 64, 128, 64, 32, 1]
    names = ["a", "b", "c", "d", "e", "f"]
    for i, n in enumerate(names):
        fan_in, fan_out = dims[i], dims[i + 1]
        p["W" + n] = (jax.random.normal(ks[2 + 2 * i], (fan_in, fan_out), jnp.float32)
                      * (1.0 / jnp.sqrt(fan_in)))
        p["b" + n] = jax.random.normal(ks[3 + 2 * i], (1, fan_out), jnp.float32) * 0.01
    # TODO(synk): self.layer_weight (input1->8->16->1 + Sigmoid) is defined in the
    # PyTorch module but never used in forward, so it is not materialized here.
    return p


def gmz_forward(params, input_linear, input_nonlinear, mean, K, train_size,
                num_criteria, test_weight=None, tb=4096):
    """Matches GMZ.forward.  `mean` is unused (as in the reference)."""
    del mean
    B = train_size
    C1 = K * num_criteria
    NC = num_criteria
    f32, bf16 = jnp.float32, jnp.bfloat16

    if test_weight is None:
        weight = jnp.float32(0.5)
    else:
        weight = jnp.asarray(test_weight, jnp.float32)

    # --- collapse the linear path and fold the blend into the constants -----
    w1 = params["w1"].reshape(C1)
    w2 = params["w2"].reshape(NC)
    v = (w1 * jnp.repeat(w2, K)).reshape(C1, 1) * weight              # (C1, 1) f32
    wf = (params["Wf"] * (1.0 - weight)).astype(f32)                  # (32, 1) f32
    bf = (params["bf"].reshape(1, 1) * (1.0 - weight)).astype(f32)    # (1, 1)  f32

    # --- feature-major (batch-on-lanes) activations --------------------------
    # bf16 x_lin halves the dominant HBM stream (precision tradeoff accepted).
    x_lin = input_linear.reshape(B, C1).astype(bf16).T                # (C1, B)
    x_nl = input_nonlinear.reshape(B, NC).astype(bf16).T              # (NC, B)

    # --- tile selection -------------------------------------------------------
    # Few, large, balanced tiles; TB multiple of 128 (lane dim); even grid >= 2
    # for B > 256 so both v7x TensorCores get work; padding waste < one tile.
    n_tiles = _ceil(B, tb)
    if B > 256:
        n_tiles = max(2, n_tiles)
        n_tiles += n_tiles % 2
    TB = _ceil(_ceil(B, n_tiles), 128) * 128
    B_pad = n_tiles * TB
    if B_pad != B:
        x_lin = jnp.pad(x_lin, ((0, 0), (0, B_pad - B)))
        x_nl = jnp.pad(x_nl, ((0, 0), (0, B_pad - B)))
    grid = (n_tiles,)

    # --- feature-major weights (out, in) / biases (out, 1) -------------------
    wa = params["Wa"].T.astype(bf16)   # (32, NC)
    wb = params["Wb"].T.astype(bf16)   # (64, 32)
    wc = params["Wc"].T.astype(bf16)   # (128, 64)
    wd = params["Wd"].T.astype(bf16)   # (64, 128)
    we = params["We"].T.astype(bf16)   # (32, 64)
    ba = params["ba"].T                # (32, 1) f32
    bb = params["bb"].T
    bc = params["bc"].T
    bd = params["bd"].T
    be = params["be"].T

    inputs = [x_lin, x_nl, v,
              wa, ba, wb, bb, wc, bc, wd, bd, we, be, wf, bf]

    def act_spec(rows):
        return pl.BlockSpec((rows, TB), lambda i: (0, i))

    def const_spec(a):
        # Constant block index -> DMA'd once, stays VMEM-resident across steps.
        return pl.BlockSpec(a.shape, lambda i: (0, 0))

    in_specs = ([act_spec(C1), act_spec(NC)] +
                [const_spec(a) for a in inputs[2:]])

    out = pl.pallas_call(
        gmz_kernel,
        out_shape=jax.ShapeDtypeStruct((1, B_pad), f32),
        grid=grid,
        in_specs=in_specs,
        out_specs=pl.BlockSpec((1, TB), lambda i: (0, i)),
        compiler_params=pltpu.CompilerParams(
            dimension_semantics=("parallel",),
            vmem_limit_bytes=48 * 1024 * 1024),
    )(*inputs)

    # Padded batch columns carry MLP-bias garbage; slice before any reduction.
    return out[0, :B].reshape(B, 1), weight


def gmz_reference(params, input_linear, input_nonlinear, K, train_size,
                  num_criteria, weight=0.5):
    """Pure-JAX f32 batch-major reference mirroring the PyTorch code."""
    B, C1, NC = train_size, K * num_criteria, num_criteria
    x_lin = input_linear.reshape(B, C1).astype(jnp.float32)
    y1 = x_lin * params["w1"].reshape(1, C1)                  # depthwise conv1
    tmp = y1.reshape(B, NC, K).sum(axis=-1)                   # temp[:, j] = sum_i y1[:, j*K+i]
    y2 = tmp * params["w2"].reshape(1, NC)                    # depthwise conv2
    linear_out = y2.sum(axis=-1, keepdims=True)
    h = input_nonlinear.reshape(B, NC).astype(jnp.float32)
    for n in ["a", "b", "c", "d", "e"]:
        h = jax.nn.relu(h @ params["W" + n] + params["b" + n])
    nonlinear_out = h @ params["Wf"] + params["bf"]
    # TODO(synk): spot-check once against the real PyTorch module; this
    # reference shares the contiguous-group interpretation of index[i::K].
    return linear_out * weight + nonlinear_out * (1.0 - weight)


if __name__ == "__main__":
    K = 4
    num_criteria = 4
    input1 = K * num_criteria      # 16
    input2 = num_criteria          # 4

    key = jax.random.PRNGKey(0)
    k_lin, k_nl, k_par, k_lin2, k_nl2 = jax.random.split(key, 5)
    params = init_params(k_par, input1, input2)

    # --- small single-tile case (B=8 -> TB=128, grid=(1,)) -------------------
    train_size = 8
    input_linear = jax.random.normal(k_lin, (train_size, input1, 1), jnp.float32)
    input_nonlinear = jax.random.normal(k_nl, (train_size, input2), jnp.float32)
    mean = jnp.zeros((input1,), jnp.float32)   # unused by forward (signature parity)

    link_out, weight = gmz_forward(params, input_linear, input_nonlinear, mean,
                                   K, train_size, num_criteria)
    link_out = jax.block_until_ready(link_out)
    ref = gmz_reference(params, input_linear, input_nonlinear, K,
                        train_size, num_criteria, weight=0.5)
    assert link_out.shape == (train_size, 1)
    # bf16 matmul operands / bf16 x_lin vs f32 reference -> relaxed tolerance.
    assert jnp.allclose(link_out, ref, rtol=2e-2, atol=2e-2), "mismatch vs reference (small)"

    # --- multi-tile case (B=600 -> TB=384, B_pad=768, grid=(2,)) -------------
    train_size2 = 600
    input_linear2 = jax.random.normal(k_lin2, (train_size2, input1, 1), jnp.float32)
    input_nonlinear2 = jax.random.normal(k_nl2, (train_size2, input2), jnp.float32)
    link_out2, _ = gmz_forward(params, input_linear2, input_nonlinear2, mean,
                               K, train_size2, num_criteria)
    link_out2 = jax.block_until_ready(link_out2)
    ref2 = gmz_reference(params, input_linear2, input_nonlinear2, K,
                         train_size2, num_criteria, weight=0.5)
    assert link_out2.shape == (train_size2, 1)
    assert jnp.allclose(link_out2, ref2, rtol=2e-2, atol=2e-2), "mismatch vs reference (tiled)"

    print("KERNEL_OK")
</pallas_src>

<mosaic_0001>
module attributes {stable_mosaic.version = 11 : i64} {
  func.func @gmz_kernel(%arg0: i32, %arg1: memref<16x128xbf16, #tpu.memory_space<vmem>>, %arg2: memref<4x128xbf16, #tpu.memory_space<vmem>>, %arg3: memref<16x1xf32, #tpu.memory_space<vmem>>, %arg4: memref<32x4xbf16, #tpu.memory_space<vmem>>, %arg5: memref<32x1xf32, #tpu.memory_space<vmem>>, %arg6: memref<64x32xbf16, #tpu.memory_space<vmem>>, %arg7: memref<64x1xf32, #tpu.memory_space<vmem>>, %arg8: memref<128x64xbf16, #tpu.memory_space<vmem>>, %arg9: memref<128x1xf32, #tpu.memory_space<vmem>>, %arg10: memref<64x128xbf16, #tpu.memory_space<vmem>>, %arg11: memref<64x1xf32, #tpu.memory_space<vmem>>, %arg12: memref<32x64xbf16, #tpu.memory_space<vmem>>, %arg13: memref<32x1xf32, #tpu.memory_space<vmem>>, %arg14: memref<32x1xf32, #tpu.memory_space<vmem>>, %arg15: memref<1x1xf32, #tpu.memory_space<vmem>>, %arg16: memref<1x128xf32, #tpu.memory_space<vmem>>) attributes {dimension_semantics = [#tpu.dimension_semantics<parallel>], iteration_bounds = array<i64: 1>, scalar_prefetch = 0 : i64, scratch_operands = 0 : i64, tpu.core_type = #tpu.core_type<tc>, window_params = [{transform_indices = @transform_0, window_bounds = array<i64: 16, 128>}, {transform_indices = @transform_1, window_bounds = array<i64: 4, 128>}, {pipeline_mode = #tpu.pipeline_mode<synchronous>, transform_indices = @transform_2, window_bounds = array<i64: 16, 1>}, {pipeline_mode = #tpu.pipeline_mode<synchronous>, transform_indices = @transform_3, window_bounds = array<i64: 32, 4>}, {pipeline_mode = #tpu.pipeline_mode<synchronous>, transform_indices = @transform_4, window_bounds = array<i64: 32, 1>}, {pipeline_mode = #tpu.pipeline_mode<synchronous>, transform_indices = @transform_5, window_bounds = array<i64: 64, 32>}, {pipeline_mode = #tpu.pipeline_mode<synchronous>, transform_indices = @transform_6, window_bounds = array<i64: 64, 1>}, {pipeline_mode = #tpu.pipeline_mode<synchronous>, transform_indices = @transform_7, window_bounds = array<i64: 128, 64>}, {pipeline_mode = #tpu.pipeline_mode<synchronous>, transform_indices = @transform_8, window_bounds = array<i64: 128, 1>}, {pipeline_mode = #tpu.pipeline_mode<synchronous>, transform_indices = @transform_9, window_bounds = array<i64: 64, 128>}, {pipeline_mode = #tpu.pipeline_mode<synchronous>, transform_indices = @transform_10, window_bounds = array<i64: 64, 1>}, {pipeline_mode = #tpu.pipeline_mode<synchronous>, transform_indices = @transform_11, window_bounds = array<i64: 32, 64>}, {pipeline_mode = #tpu.pipeline_mode<synchronous>, transform_indices = @transform_12, window_bounds = array<i64: 32, 1>}, {pipeline_mode = #tpu.pipeline_mode<synchronous>, transform_indices = @transform_13, window_bounds = array<i64: 32, 1>}, {pipeline_mode = #tpu.pipeline_mode<synchronous>, transform_indices = @transform_14, window_bounds = array<i64: 1, 1>}, {transform_indices = @transform_15, window_bounds = array<i64: 1, 128>}]} {
    %c0 = arith.constant 0 : index
    %c0_0 = arith.constant 0 : index
    %0 = vector.load %arg1[%c0, %c0_0] : memref<16x128xbf16, #tpu.memory_space<vmem>>, vector<16x128xbf16>
    %1 = arith.extf %0 : vector<16x128xbf16> to vector<16x128xf32>
    %c0_1 = arith.constant 0 : index
    %c0_2 = arith.constant 0 : index
    %2 = vector.load %arg3[%c0_1, %c0_2] : memref<16x1xf32, #tpu.memory_space<vmem>>, vector<16x1xf32>
    %3 = vector.broadcast %2 : vector<16x1xf32> to vector<16x128xf32>
    %4 = arith.mulf %1, %3 : vector<16x128xf32>
    %cst = arith.constant dense<0.000000e+00> : vector<128xf32>
    %5 = vector.multi_reduction <add>, %4, %cst [0] : vector<16x128xf32> to vector<128xf32>
    %6 = vector.shape_cast %5 : vector<128xf32> to vector<1x128xf32>
    %c0_3 = arith.constant 0 : index
    %c0_4 = arith.constant 0 : index
    %7 = vector.load %arg2[%c0_3, %c0_4] : memref<4x128xbf16, #tpu.memory_space<vmem>>, vector<4x128xbf16>
    %c0_5 = arith.constant 0 : index
    %c0_6 = arith.constant 0 : index
    %8 = vector.load %arg4[%c0_5, %c0_6] : memref<32x4xbf16, #tpu.memory_space<vmem>>, vector<32x4xbf16>
    %cst_7 = arith.constant dense<0.000000e+00> : vector<32x128xf32>
    %9 = tpu.matmul %8, %7, %cst_7 {dimension_numbers = #tpu.dot_dimension_numbers<[1], [0], [0], [1], [0, 0, 1, 1], [], []>} : vector<32x4xbf16>, vector<4x128xbf16>, vector<32x128xf32> -> vector<32x128xf32>
    %c0_8 = arith.constant 0 : index
    %c0_9 = arith.constant 0 : index
    %10 = vector.load %arg5[%c0_8, %c0_9] : memref<32x1xf32, #tpu.memory_space<vmem>>, vector<32x1xf32>
    %11 = vector.broadcast %10 : vector<32x1xf32> to vector<32x128xf32>
    %12 = arith.addf %9, %11 : vector<32x128xf32>
    %cst_10 = arith.constant 0.000000e+00 : f32
    %13 = vector.broadcast %cst_10 : f32 to vector<32x128xf32>
    %14 = arith.maximumf %12, %13 : vector<32x128xf32>
    %c0_11 = arith.constant 0 : index
    %c0_12 = arith.constant 0 : index
    %15 = vector.load %arg6[%c0_11, %c0_12] : memref<64x32xbf16, #tpu.memory_space<vmem>>, vector<64x32xbf16>
    %16 = arith.truncf %14 : vector<32x128xf32> to vector<32x128xbf16>
    %cst_13 = arith.constant dense<0.000000e+00> : vector<64x128xf32>
    %17 = tpu.matmul %15, %16, %cst_13 {dimension_numbers = #tpu.dot_dimension_numbers<[1], [0], [0], [1], [0, 0, 1, 1], [], []>} : vector<64x32xbf16>, vector<32x128xbf16>, vector<64x128xf32> -> vector<64x128xf32>
    %c0_14 = arith.constant 0 : index
    %c0_15 = arith.constant 0 : index
    %18 = vector.load %arg7[%c0_14, %c0_15] : memref<64x1xf32, #tpu.memory_space<vmem>>, vector<64x1xf32>
    %19 = vector.broadcast %18 : vector<64x1xf32> to vector<64x128xf32>
    %20 = arith.addf %17, %19 : vector<64x128xf32>
    %cst_16 = arith.constant 0.000000e+00 : f32
    %21 = vector.broadcast %cst_16 : f32 to vector<64x128xf32>
    %22 = arith.maximumf %20, %21 : vector<64x128xf32>
    %c0_17 = arith.constant 0 : index
    %c0_18 = arith.constant 0 : index
    %23 = vector.load %arg8[%c0_17, %c0_18] : memref<128x64xbf16, #tpu.memory_space<vmem>>, vector<128x64xbf16>
    %24 = arith.truncf %22 : vector<64x128xf32> to vector<64x128xbf16>
    %cst_19 = arith.constant dense<0.000000e+00> : vector<128x128xf32>
    %25 = tpu.matmul %23, %24, %cst_19 {dimension_numbers = #tpu.dot_dimension_numbers<[1], [0], [0], [1], [0, 0, 1, 1], [], []>} : vector<128x64xbf16>, vector<64x128xbf16>, vector<128x128xf32> -> vector<128x128xf32>
    %c0_20 = arith.constant 0 : index
    %c0_21 = arith.constant 0 : index
    %26 = vector.load %arg9[%c0_20, %c0_21] : memref<128x1xf32, #tpu.memory_space<vmem>>, vector<128x1xf32>
    %27 = vector.broadcast %26 : vector<128x1xf32> to vector<128x128xf32>
    %28 = arith.addf %25, %27 : vector<128x128xf32>
    %cst_22 = arith.constant 0.000000e+00 : f32
    %29 = vector.broadcast %cst_22 : f32 to vector<128x128xf32>
    %30 = arith.maximumf %28, %29 : vector<128x128xf32>
    %c0_23 = arith.constant 0 : index
    %c0_24 = arith.constant 0 : index
    %31 = vector.load %arg10[%c0_23, %c0_24] : memref<64x128xbf16, #tpu.memory_space<vmem>>, vector<64x128xbf16>
    %32 = arith.truncf %30 : vector<128x128xf32> to vector<128x128xbf16>
    %cst_25 = arith.constant dense<0.000000e+00> : vector<64x128xf32>
    %33 = tpu.matmul %31, %32, %cst_25 {dimension_numbers = #tpu.dot_dimension_numbers<[1], [0], [0], [1], [0, 0, 1, 1], [], []>} : vector<64x128xbf16>, vector<128x128xbf16>, vector<64x128xf32> -> vector<64x128xf32>
    %c0_26 = arith.constant 0 : index
    %c0_27 = arith.constant 0 : index
    %34 = vector.load %arg11[%c0_26, %c0_27] : memref<64x1xf32, #tpu.memory_space<vmem>>, vector<64x1xf32>
    %35 = vector.broadcast %34 : vector<64x1xf32> to vector<64x128xf32>
    %36 = arith.addf %33, %35 : vector<64x128xf32>
    %cst_28 = arith.constant 0.000000e+00 : f32
    %37 = vector.broadcast %cst_28 : f32 to vector<64x128xf32>
    %38 = arith.maximumf %36, %37 : vector<64x128xf32>
    %c0_29 = arith.constant 0 : index
    %c0_30 = arith.constant 0 : index
    %39 = vector.load %arg12[%c0_29, %c0_30] : memref<32x64xbf16, #tpu.memory_space<vmem>>, vector<32x64xbf16>
    %40 = arith.truncf %38 : vector<64x128xf32> to vector<64x128xbf16>
    %cst_31 = arith.constant dense<0.000000e+00> : vector<32x128xf32>
    %41 = tpu.matmul %39, %40, %cst_31 {dimension_numbers = #tpu.dot_dimension_numbers<[1], [0], [0], [1], [0, 0, 1, 1], [], []>} : vector<32x64xbf16>, vector<64x128xbf16>, vector<32x128xf32> -> vector<32x128xf32>
    %c0_32 = arith.constant 0 : index
    %c0_33 = arith.constant 0 : index
    %42 = vector.load %arg13[%c0_32, %c0_33] : memref<32x1xf32, #tpu.memory_space<vmem>>, vector<32x1xf32>
    %43 = vector.broadcast %42 : vector<32x1xf32> to vector<32x128xf32>
    %44 = arith.addf %41, %43 : vector<32x128xf32>
    %cst_34 = arith.constant 0.000000e+00 : f32
    %45 = vector.broadcast %cst_34 : f32 to vector<32x128xf32>
    %46 = arith.maximumf %44, %45 : vector<32x128xf32>
    %c0_35 = arith.constant 0 : index
    %c0_36 = arith.constant 0 : index
    %47 = vector.load %arg14[%c0_35, %c0_36] : memref<32x1xf32, #tpu.memory_space<vmem>>, vector<32x1xf32>
    %48 = vector.broadcast %47 : vector<32x1xf32> to vector<32x128xf32>
    %49 = arith.mulf %46, %48 : vector<32x128xf32>
    %cst_37 = arith.constant dense<0.000000e+00> : vector<128xf32>
    %50 = vector.multi_reduction <add>, %49, %cst_37 [0] : vector<32x128xf32> to vector<128xf32>
    %51 = vector.shape_cast %50 : vector<128xf32> to vector<1x128xf32>
    %c0_38 = arith.constant 0 : index
    %c0_39 = arith.constant 0 : index
    %52 = vector.load %arg15[%c0_38, %c0_39] : memref<1x1xf32, #tpu.memory_space<vmem>>, vector<1x1xf32>
    %53 = vector.broadcast %52 : vector<1x1xf32> to vector<1x128xf32>
    %54 = arith.addf %51, %53 : vector<1x128xf32>
    %55 = arith.addf %6, %54 : vector<1x128xf32>
    %c0_40 = arith.constant 0 : index
    %c0_41 = arith.constant 0 : index
    %56 = vector.load %arg16[%c0_40, %c0_41] : memref<1x128xf32, #tpu.memory_space<vmem>>, vector<1x128xf32>
    tpu.vector_store %arg16[%c0_40, %c0_41], %55 {strides = array<i32>} : memref<1x128xf32, #tpu.memory_space<vmem>>, vector<1x128xf32>,
    return
  }
  func.func @transform_0(%arg0: i32) -> (i32, i32) {
    %c0_i32 = arith.constant 0 : i32
    %c0_i32_0 = arith.constant 0 : i32
    return %c0_i32, %arg0 : i32, i32
  }
  func.func @transform_1(%arg0: i32) -> (i32, i32) {
    %c0_i32 = arith.constant 0 : i32
    %c0_i32_0 = arith.constant 0 : i32
    return %c0_i32, %arg0 : i32, i32
  }
  func.func @transform_2(%arg0: i32) -> (i32, i32) {
    %c0_i32 = arith.constant 0 : i32
    %c0_i32_0 = arith.constant 0 : i32
    %c0_i32_1 = arith.constant 0 : i32
    return %c0_i32, %c0_i32_0 : i32, i32
  }
  func.func @transform_3(%arg0: i32) -> (i32, i32) {
    %c0_i32 = arith.constant 0 : i32
    %c0_i32_0 = arith.constant 0 : i32
    %c0_i32_1 = arith.constant 0 : i32
    return %c0_i32, %c0_i32_0 : i32, i32
  }
  func.func @transform_4(%arg0: i32) -> (i32, i32) {
    %c0_i32 = arith.constant 0 : i32
    %c0_i32_0 = arith.constant 0 : i32
    %c0_i32_1 = arith.constant 0 : i32
    return %c0_i32, %c0_i32_0 : i32, i32
  }
  func.func @transform_5(%arg0: i32) -> (i32, i32) {
    %c0_i32 = arith.constant 0 : i32
    %c0_i32_0 = arith.constant 0 : i32
    %c0_i32_1 = arith.constant 0 : i32
    return %c0_i32, %c0_i32_0 : i32, i32
  }
  func.func @transform_6(%arg0: i32) -> (i32, i32) {
    %c0_i32 = arith.constant 0 : i32
    %c0_i32_0 = arith.constant 0 : i32
    %c0_i32_1 = arith.constant 0 : i32
    return %c0_i32, %c0_i32_0 : i32, i32
  }
  func.func @transform_7(%arg0: i32) -> (i32, i32) {
    %c0_i32 = arith.constant 0 : i32
    %c0_i32_0 = arith.constant 0 : i32
    %c0_i32_1 = arith.constant 0 : i32
    return %c0_i32, %c0_i32_0 : i32, i32
  }
  func.func @transform_8(%arg0: i32) -> (i32, i32) {
    %c0_i32 = arith.constant 0 : i32
    %c0_i32_0 = arith.constant 0 : i32
    %c0_i32_1 = arith.constant 0 : i32
    return %c0_i32, %c0_i32_0 : i32, i32
  }
  func.func @transform_9(%arg0: i32) -> (i32, i32) {
    %c0_i32 = arith.constant 0 : i32
    %c0_i32_0 = arith.constant 0 : i32
    %c0_i32_1 = arith.constant 0 : i32
    return %c0_i32, %c0_i32_0 : i32, i32
  }
  func.func @transform_10(%arg0: i32) -> (i32, i32) {
    %c0_i32 = arith.constant 0 : i32
    %c0_i32_0 = arith.constant 0 : i32
    %c0_i32_1 = arith.constant 0 : i32
    return %c0_i32, %c0_i32_0 : i32, i32
  }
  func.func @transform_11(%arg0: i32) -> (i32, i32) {
    %c0_i32 = arith.constant 0 : i32
    %c0_i32_0 = arith.constant 0 : i32
    %c0_i32_1 = arith.constant 0 : i32
    return %c0_i32, %c0_i32_0 : i32, i32
  }
  func.func @transform_12(%arg0: i32) -> (i32, i32) {
    %c0_i32 = arith.constant 0 : i32
    %c0_i32_0 = arith.constant 0 : i32
    %c0_i32_1 = arith.constant 0 : i32
    return %c0_i32, %c0_i32_0 : i32, i32
  }
  func.func @transform_13(%arg0: i32) -> (i32, i32) {
    %c0_i32 = arith.constant 0 : i32
    %c0_i32_0 = arith.constant 0 : i32
    %c0_i32_1 = arith.constant 0 : i32
    return %c0_i32, %c0_i32_0 : i32, i32
  }
  func.func @transform_14(%arg0: i32) -> (i32, i32) {
    %c0_i32 = arith.constant 0 : i32
    %c0_i32_0 = arith.constant 0 : i32
    %c0_i32_1 = arith.constant 0 : i32
    return %c0_i32, %c0_i32_0 : i32, i32
  }
  func.func @transform_15(%arg0: i32) -> (i32, i32) {
    %c0_i32 = arith.constant 0 : i32
    %c0_i32_0 = arith.constant 0 : i32
    return %c0_i32, %arg0 : i32, i32
  }
}

</mosaic_0001>

<bundles_post_ra>
// kernel: tpu_custom_call.1
= control target key start
LH: loop header
LB: loop body
LE: loop exit
PB: predicated region body
PF: predicated region fallthrough
CT: control target
= control target key end

     0   :  { %s1487_s0 = inlined_call_operand.vmem [shape: bf16[16,128], index: 0, kind: input, shape index: {}]   ;;  %s1488_s1 = inlined_call_operand.vmem [shape: bf16[4,128], index: 1, kind: input, shape index: {}]   ;;  %s1489_s2 = inlined_call_operand.vmem [shape: f32[16,1], index: 2, kind: input, shape index: {}]   ;;  %s1490_s3 = inlined_call_operand.vmem [shape: bf16[32,4], index: 3, kind: input, shape index: {}]   ;;  %s1491_s4 = inlined_call_operand.vmem [shape: f32[32,1], index: 4, kind: input, shape index: {}]   ;;  %s1492_s5 = inlined_call_operand.vmem [shape: bf16[64,32], index: 5, kind: input, shape index: {}]   ;;  %s1493_s6 = inlined_call_operand.vmem [shape: f32[64,1], index: 6, kind: input, shape index: {}]   ;;  %s1494_s7 = inlined_call_operand.vmem [shape: bf16[128,64], index: 7, kind: input, shape index: {}]   ;;  %s1495_s8 = inlined_call_operand.vmem [shape: f32[128,1], index: 8, kind: input, shape index: {}]   ;;  %s1496_s9 = inlined_call_operand.vmem [shape: bf16[64,128], index: 9, kind: input, shape index: {}]   ;;  %s1497_s10 = inlined_call_operand.vmem [shape: f32[64,1], index: 10, kind: input, shape index: {}]   ;;  %s1498_s11 = inlined_call_operand.vmem [shape: bf16[32,64], index: 11, kind: input, shape index: {}]   ;;  %s1499_s12 = inlined_call_operand.vmem [shape: f32[32,1], index: 12, kind: input, shape index: {}]   ;;  %s1500_s13 = inlined_call_operand.vmem [shape: f32[32,1], index: 13, kind: input, shape index: {}]   ;;  %s1501_s14 = inlined_call_operand.<no memory space> [shape: f32[1,1], index: 14, kind: input, shape index: {}]   ;;  %s1502_s15 = inlined_call_operand.hbm [shape: f32[1,128], index: 15, kind: output, shape index: {}]  }
   0x1   :  { %v20_v0 = vstv %s1501_s14 }
   0x2   :  { %21 = vst [vmem:[#allocation2] sm:$0x1] %v20_v0 }
   0x3   :  { %v79_v1 = vld [vmem:[%s1488_s1] sm:$0x3]  ;;  %vm125_vm0 = vcmask 1041408   ;;  %v86_v2 = vld [vmem:[%s1491_s4 + $0x10] sm:$0xff]  ;;  %v1172_v4 = vmov 0   ;;  %vm118_vm1 = vcmask 31744  }
   0x4   :  { %v84_v3 = vld [vmem:[%s1491_s4] sm:$0xff]  ;;  %1123 = vmatprep.subr.msk.bf16.mxu0 %vm125_vm0, %v79_v1  ;;  %1127 = vset.pattern.permute.xlu1 %v1172_v4  ;;  %v127_v5 = vsel %vm125_vm0, %v79_v1, 0  ;;  %v1129_v7 = vld [vmem:[%s1490_s3 + $0x8] sm:$0xff]   ;;  %v87_v8 = vld [vmem:[%s1491_s4 + $0x18] sm:$0xff] }
   0x5   :  { %v1128_v6 = vld [vmem:[%s1490_s3] sm:$0xff]   ;;  %1126 = vset.pattern.permute.xlu0 %v1172_v4  ;;  %1046 = vmatpush3.bf16.msra.mxu0 %v127_v5  ;;  %v85_v9 = vld [vmem:[%s1491_s4 + $0x8] sm:$0xff]  ;;  %v195_v12 = vld [vmem:[%s1493_s6 + $0x18] sm:$0xff] }
   0x6   :  { %100 = vperm.xlu1 %1127, %v86_v2   ;;  %90 = vperm.xlu0 %1126, %v84_v3   ;;  %v193_v10 = vld [vmem:[%s1493_s6 + $0x8] sm:$0xff]  ;;  %v192_v11 = vld [vmem:[%s1493_s6] sm:$0xff]  ;;  %v194_v13 = vld [vmem:[%s1493_s6 + $0x10] sm:$0xff] }
   0x7   :  { %1047 = vmatprep.mubr.msk.bf16.mxu0 %vm118_vm1, %v1128_v6  ;;  %v197_v14 = vld [vmem:[%s1493_s6 + $0x28] sm:$0xff]  ;;  %v196_v15 = vld [vmem:[%s1493_s6 + $0x20] sm:$0xff]  ;;  %v199_v16 = vld [vmem:[%s1493_s6 + $0x38] sm:$0xff] }
   0x8   :  { %1048 = vmatmul.mubr.msk.bf16.vlgmr.msra.gmra.mrb[0].mxu0 %vm118_vm1, %v1129_v7  ;;  %v198_v17 = vld [vmem:[%s1493_s6 + $0x30] sm:$0xff]  ;;  %v367_v18 = vld [vmem:[%s1495_s8 + $0x8] sm:$0xff]  ;;  %v366_v19 = vld [vmem:[%s1495_s8] sm:$0xff] }
   0x9   :  { %v369_v20 = vld [vmem:[%s1495_s8 + $0x18] sm:$0xff]  ;;  %v368_v21 = vld [vmem:[%s1495_s8 + $0x10] sm:$0xff] }
   0xa   :  { %105 = vperm.xlu1 %1127, %v87_v8   ;;  %95 = vperm.xlu0 %1126, %v85_v9  }
   0xe   :  { %207 = vperm.xlu1 %1127, %v193_v10   ;;  %202 = vperm.xlu0 %1126, %v192_v11  }
  0x12   :  { %217 = vperm.xlu1 %1127, %v195_v12   ;;  %212 = vperm.xlu0 %1126, %v194_v13  }
  0x16   :  { %227 = vperm.xlu1 %1127, %v197_v14   ;;  %222 = vperm.xlu0 %1126, %v196_v15  }
  0x1a   :  { %237 = vperm.xlu1 %1127, %v199_v16   ;;  %232 = vperm.xlu0 %1126, %v198_v17  }
  0x1e   :  { %389 = vperm.xlu1 %1127, %v367_v18   ;;  %384 = vperm.xlu0 %1126, %v366_v19  }
  0x1f   :  { %22 = vsyncpa [#allocation4], 0  ;;  %v371_v22 = vld [vmem:[%s1495_s8 + $0x28] sm:$0xff]  ;;  %v370_v23 = vld [vmem:[%s1495_s8 + $0x20] sm:$0xff]  ;;  %vm260_vm2 = vcmask 261120   ;;  %vm502_vm3 = vcmask 523264  }
  0x20   :  { %v373_v24 = vld [vmem:[%s1495_s8 + $0x38] sm:$0xff]  ;;  %v372_v25 = vld [vmem:[%s1495_s8 + $0x30] sm:$0xff]  ;;  %v375_v26 = vld [vmem:[%s1495_s8 + $0x48] sm:$0xff] }
  0x21   :  { %v374_v27 = vld [vmem:[%s1495_s8 + $0x40] sm:$0xff]  ;;  %v377_v28 = vld [vmem:[%s1495_s8 + $0x58] sm:$0xff]  ;;  %v376_v29 = vld [vmem:[%s1495_s8 + $0x50] sm:$0xff] }
  0x22   :  { %399 = vperm.xlu1 %1127, %v369_v20   ;;  %394 = vperm.xlu0 %1126, %v368_v21   ;;  %v379_v30 = vld [vmem:[%s1495_s8 + $0x68] sm:$0xff]  ;;  %v378_v31 = vld [vmem:[%s1495_s8 + $0x60] sm:$0xff]  ;;  %v381_v32 = vld [vmem:[%s1495_s8 + $0x78] sm:$0xff] }
  0x23   :  { %v380_v33 = vld [vmem:[%s1495_s8 + $0x70] sm:$0xff]  ;;  %v657_v34 = vld [vmem:[%s1497_s10 + $0x8] sm:$0xff]  ;;  %v656_v35 = vld [vmem:[%s1497_s10] sm:$0xff] }
  0x24   :  { %v659_v36 = vld [vmem:[%s1497_s10 + $0x18] sm:$0xff]  ;;  %v658_v37 = vld [vmem:[%s1497_s10 + $0x10] sm:$0xff]  ;;  %v661_v38 = vld [vmem:[%s1497_s10 + $0x28] sm:$0xff] }
  0x25   :  { %v660_v39 = vld [vmem:[%s1497_s10 + $0x20] sm:$0xff]  ;;  %v663_v40 = vld [vmem:[%s1497_s10 + $0x38] sm:$0xff]  ;;  %v662_v41 = vld [vmem:[%s1497_s10 + $0x30] sm:$0xff] }
  0x26   :  { %409 = vperm.xlu1 %1127, %v371_v22   ;;  %404 = vperm.xlu0 %1126, %v370_v23   ;;  %v810_v42 = vld [vmem:[%s1499_s12 + $0x8] sm:$0xff]  ;;  %v809_v43 = vld [vmem:[%s1499_s12] sm:$0xff]  ;;  %v812_v44 = vld [vmem:[%s1499_s12 + $0x18] sm:$0xff] }
  0x27   :  { %v811_v45 = vld [vmem:[%s1499_s12 + $0x10] sm:$0xff]  ;;  %v903_v46 = vld [vmem:[%s1500_s13 + $0x8] sm:$0xff]  ;;  %v902_v47 = vld [vmem:[%s1500_s13] sm:$0xff] }
  0x28   :  { %v905_v48 = vld [vmem:[%s1500_s13 + $0x18] sm:$0xff]  ;;  %v904_v49 = vld [vmem:[%s1500_s13 + $0x10] sm:$0xff]  ;;  %v59_v50 = vld [vmem:[%s1489_s2 + $0x8] sm:$0xff] }
  0x29   :  { %v58_v51 = vld [vmem:[%s1489_s2] sm:$0xff]  ;;  %v1131_v8 = vld [vmem:[%s1492_s5 + $0x8] sm:$0xff]   ;;  %v1132_v9 = vld [vmem:[%s1492_s5 + $0x10] sm:$0xff]  }
  0x2a   :  { %419 = vperm.xlu1 %1127, %v373_v24   ;;  %414 = vperm.xlu0 %1126, %v372_v25   ;;  %v939_v52 = vld [vmem:[#allocation2] sm:$0x1]  ;;  %v1133_v10 = vld [vmem:[%s1492_s5 + $0x18] sm:$0xff]  }
  0x2b   :  { %v1130_v53 = vld [vmem:[%s1492_s5] sm:$0xff]  }
  0x2c   :  { %1055 = vmatprep.mubr.msk.bf16.mxu1 %vm260_vm2, %v1130_v53  ;;  %v1134_v11 = vld [vmem:[%s1494_s7] sm:$0xff]   ;;  %v1140_v53 = vld [vmem:[%s1494_s7 + $0x30] sm:$0xff]  }
  0x2d   :  { %1071 = vmatprep.mubr.msk.bf16.mxu0 %vm502_vm3, %v1134_v11 }
  0x2e   :  { %429 = vperm.xlu1 %1127, %v375_v26   ;;  %424 = vperm.xlu0 %1126, %v374_v27  }
  0x32   :  { %439 = vperm.xlu1 %1127, %v377_v28   ;;  %434 = vperm.xlu0 %1126, %v376_v29  }
  0x36   :  { %449 = vperm.xlu1 %1127, %v379_v30   ;;  %444 = vperm.xlu0 %1126, %v378_v31  }
  0x3a   :  { %459 = vperm.xlu1 %1127, %v381_v32   ;;  %454 = vperm.xlu0 %1126, %v380_v33  }
  0x3e   :  { %671 = vperm.xlu1 %1127, %v657_v34   ;;  %666 = vperm.xlu0 %1126, %v656_v35  }
  0x42   :  { %681 = vperm.xlu1 %1127, %v659_v36   ;;  %676 = vperm.xlu0 %1126, %v658_v37  }
  0x46   :  { %691 = vperm.xlu1 %1127, %v661_v38   ;;  %686 = vperm.xlu0 %1126, %v660_v39  }
  0x4a   :  { %701 = vperm.xlu1 %1127, %v663_v40   ;;  %696 = vperm.xlu0 %1126, %v662_v41  }
  0x4e   :  { %820 = vperm.xlu1 %1127, %v810_v42   ;;  %815 = vperm.xlu0 %1126, %v809_v43  }
  0x52   :  { %830 = vperm.xlu1 %1127, %v812_v44   ;;  %825 = vperm.xlu0 %1126, %v811_v45  }
  0x56   :  { %913 = vperm.xlu1 %1127, %v903_v46   ;;  %908 = vperm.xlu0 %1126, %v902_v47  }
  0x5a   :  { %923 = vperm.xlu1 %1127, %v905_v48   ;;  %918 = vperm.xlu0 %1126, %v904_v49   ;;  %v1135_v48 = vld [vmem:[%s1494_s7 + $0x8] sm:$0xff]   ;;  %v1136_v49 = vld [vmem:[%s1494_s7 + $0x10] sm:$0xff]  }
  0x5e   :  { %67 = vperm.xlu1 %1127, %v59_v50   ;;  %62 = vperm.xlu0 %1126, %v58_v51   ;;  %v1137_v50 = vld [vmem:[%s1494_s7 + $0x18] sm:$0xff]   ;;  %v1138_v51 = vld [vmem:[%s1494_s7 + $0x20] sm:$0xff]  }
  0x62   :  { %942 = vperm.xlu0 %1126, %v939_v52   ;;  %v1139_v52 = vld [vmem:[%s1494_s7 + $0x28] sm:$0xff]  }
  0x85   :  { %v101_v54 = vpop.permute.xlu1 %100  ;;  %v91_v55 = vpop.permute.xlu0 %90 }
  0x89   :  { %v106_v59 = vpop.permute.xlu1 %105  ;;  %v96_v62 = vpop.permute.xlu0 %95 }
  0x8d   :  { %v203_v12 = vpop.permute.xlu0 %202  ;;  %v208_v13 = vpop.permute.xlu1 %207 }
  0x91   :  { %v213_v14 = vpop.permute.xlu0 %212  ;;  %v218_v15 = vpop.permute.xlu1 %217 }
  0x95   :  { %v223_v19 = vpop.permute.xlu0 %222  ;;  %v228_v24 = vpop.permute.xlu1 %227 }
  0x99   :  { %v233_v31 = vpop.permute.xlu0 %232  ;;  %v238_v36 = vpop.permute.xlu1 %237 }
  0xdb   :  { %v1049_v56 = vpop.f32.mrb[0].mxu0 }
  0xdc   :  { %v163_v57 = vpop.f32.mrb[1].mxu0  ;;  %v172_v58 = vadd.f32 %v1049_v56, %v101_v54  ;;  %v1141_v54 = vld [vmem:[%s1494_s7 + $0x38] sm:$0xff]   ;;  %v385_v56 = vpop.permute.xlu0 %384 }
  0xdd   :  { %v164_v60 = vadd.f32 %v163_v57, %v91_v55  ;;  %v1050_v61 = vpop.f32.mrb[2].mxu0  ;;  %v1142_v55 = vld [vmem:[%s1496_s9] sm:$0xff]   ;;  %v390_v57 = vpop.permute.xlu1 %389 }
  0xde   :  { %v175_v63 = vadd.f32 %v1050_v61, %v106_v59  ;;  %v166_v0 = vpop.f32.mrb[3].mxu0  ;;  %v180_v2 = vmax.f32 %v172_v58, 0.0 }
  0xdf   :  { %v167_v1 = vadd.f32 %v166_v0, %v96_v62  ;;  %v178_v4 = vmax.f32 %v164_v60, 0.0 }
  0xe0   :  { %v181_v3 = vmax.f32 %v175_v63, 0.0  ;;  %v395_v58 = vpop.permute.xlu0 %394 }
  0xe1   :  { %v179_v5 = vmax.f32 %v167_v1, 0.0  ;;  %v400_v59 = vpop.permute.xlu1 %399 }
  0xe2   :  { %v191_v6 = vpack.c.bf16 %v181_v3, %v180_v2 }
  0xe3   :  { %v190_v7 = vpack.c.bf16 %v179_v5, %v178_v4 }
  0xe4   :  { %v405_v60 = vpop.permute.xlu0 %404 }
  0xe5   :  { %1051 = vmatprep.subr.bf16.mxu1 %v190_v7  ;;  %v410_v61 = vpop.permute.xlu1 %409 }
  0xe6   :  { %1052 = vmatpush3.bf16.msra.mxu1 %v190_v7 }
  0xe7   :  { %1053 = vmatprep.subr.bf16.mxu1 %v191_v6 }
  0xe8   :  { %v415_v62 = vpop.permute.xlu0 %414 }
  0xe9   :  { %v420_v2 = vpop.permute.xlu1 %419 }
  0xea   :  { %1054 = vmatpush3.bf16.msra.mxu1 %v191_v6 }
  0xed   :  { %1056 = vmatmul.mubr.msk.bf16.vlgmr.msra.gmra.mrb[0].mxu1 %vm260_vm2, %v1131_v8 }
  0xee   :  { %1059 = vmatprep.mubr.msk.bf16.mxu1 %vm260_vm2, %v1132_v9 }
  0xf5   :  { %1060 = vmatmul.mubr.msk.bf16.gmra.mrb[4].mxu1 %vm260_vm2, %v1133_v10  ;;  %v425_v10 = vpop.permute.xlu0 %424 }
  0xf6   :  { %1103 = vmatprep.mubr.bf16.mxu1 %v1142_v55 }
 0x1c0   :  { %v1057_v16 = vpop.f32.mrb[0].mxu1 }
 0x1c1   :  { %v316_v17 = vadd.f32 %v1057_v16, %v213_v14  ;;  %v307_v18 = vpop.f32.mrb[1].mxu1  ;;  %v430_v14 = vpop.permute.xlu1 %429 }
 0x1c2   :  { %v308_v20 = vadd.f32 %v307_v18, %v203_v12  ;;  %v1058_v21 = vpop.f32.mrb[2].mxu1 }
 0x1c3   :  { %v319_v22 = vadd.f32 %v1058_v21, %v218_v15  ;;  %v310_v23 = vpop.f32.mrb[3].mxu1  ;;  %v340_v26 = vmax.f32 %v316_v17, 0.0 }
 0x1c4   :  { %v311_v25 = vadd.f32 %v310_v23, %v208_v13  ;;  %v338_v28 = vmax.f32 %v308_v20, 0.0  ;;  %v435_v23 = vpop.permute.xlu0 %434 }
 0x1c5   :  { %v341_v27 = vmax.f32 %v319_v22, 0.0 }
 0x1c6   :  { %v339_v29 = vmax.f32 %v311_v25, 0.0 }
 0x1c7   :  { %v363_v30 = vpack.c.bf16 %v341_v27, %v340_v26  ;;  %v440_v27 = vpop.permute.xlu1 %439 }
 0x1c8   :  { %v362_v32 = vpack.c.bf16 %v339_v29, %v338_v28  ;;  %v1061_v33 = vpop.f32.mrb[4].mxu1 }
 0x1c9   :  { %v332_v34 = vadd.f32 %v1061_v33, %v233_v31  ;;  %v323_v35 = vpop.f32.mrb[5].mxu1 }
 0x1ca   :  { %v324_v37 = vadd.f32 %v323_v35, %v223_v19  ;;  %v1062_v38 = vpop.f32.mrb[6].mxu1  ;;  %1063 = vmatprep.subr.bf16.mxu0 %v362_v32  ;;  %v445_v35 = vpop.permute.xlu0 %444 }
 0x1cb   :  { %v335_v39 = vadd.f32 %v1062_v38, %v238_v36  ;;  %v326_v40 = vpop.f32.mrb[7].mxu1  ;;  %1064 = vmatpush3.bf16.msra.mxu0 %v362_v32  ;;  %v344_v42 = vmax.f32 %v332_v34, 0.0 }
 0x1cc   :  { %v327_v41 = vadd.f32 %v326_v40, %v228_v24  ;;  %1065 = vmatprep.subr.bf16.mxu0 %v363_v30  ;;  %v342_v44 = vmax.f32 %v324_v37, 0.0  ;;  %v450_v40 = vpop.permute.xlu1 %449 }
 0x1cd   :  { %v345_v43 = vmax.f32 %v335_v39, 0.0 }
 0x1ce   :  { %v343_v45 = vmax.f32 %v327_v41, 0.0 }
 0x1cf   :  { %v365_v46 = vpack.c.bf16 %v345_v43, %v344_v42  ;;  %1066 = vmatpush3.bf16.msra.mxu0 %v363_v30 }
 0x1d0   :  { %v364_v47 = vpack.c.bf16 %v343_v45, %v342_v44 }
 0x1d2   :  { %1067 = vmatprep.subr.bf16.mxu0 %v364_v47 }
 0x1d3   :  { %1068 = vmatpush3.bf16.msra.mxu0 %v364_v47  ;;  %v455_v47 = vpop.permute.xlu0 %454 }
 0x1d4   :  { %1069 = vmatprep.subr.bf16.mxu0 %v365_v46 }
 0x1d7   :  { %1070 = vmatpush3.bf16.msra.mxu0 %v365_v46 }
 0x1da   :  { %1072 = vmatmul.mubr.msk.bf16.vlgmr.msra.gmra.mrb[4].mxu0 %vm502_vm3, %v1135_v48 }
 0x1db   :  { %1075 = vmatprep.mubr.msk.bf16.mxu0 %vm502_vm3, %v1136_v49 }
 0x1e2   :  { %1076 = vmatmul.mubr.msk.bf16.gmra.mrb[8].mxu0 %vm502_vm3, %v1137_v50 }
 0x1e3   :  { %1079 = vmatprep.mubr.msk.bf16.mxu0 %vm502_vm3, %v1138_v51 }
 0x1ea   :  { %1080 = vmatmul.mubr.msk.bf16.gmra.mrb[12].mxu0 %vm502_vm3, %v1139_v52  ;;  %v460_v52 = vpop.permute.xlu1 %459 }
 0x1eb   :  { %1083 = vmatprep.mubr.msk.bf16.mxu0 %vm502_vm3, %v1140_v53 }
 0x1f2   :  { %1084 = vmatmul.mubr.msk.bf16.gmra.mrb[16].mxu0 %vm502_vm3, %v1141_v54 }
 0x2ad   :  { %v1073_v63 = vpop.f32.mrb[4].mxu0 }
 0x2ae   :  { %v570_v0 = vadd.f32 %v1073_v63, %v395_v58  ;;  %v561_v1 = vpop.f32.mrb[5].mxu0 }
 0x2af   :  { %v562_v3 = vadd.f32 %v561_v1, %v385_v56  ;;  %v1074_v4 = vpop.f32.mrb[6].mxu0  ;;  %v1144_v1 = vld [vmem:[%s1496_s9 + $0x10] sm:$0xff]  }
 0x2b0   :  { %v573_v5 = vadd.f32 %v1074_v4, %v400_v59  ;;  %v564_v6 = vpop.f32.mrb[7].mxu0  ;;  %v626_v8 = vmax.f32 %v570_v0, 0.0  ;;  %v1143_v0 = vld [vmem:[%s1496_s9 + $0x8] sm:$0xff]   ;;  %v667_v4 = vpop.permute.xlu0 %666 }
 0x2b1   :  { %v565_v7 = vadd.f32 %v564_v6, %v390_v57  ;;  %v624_v11 = vmax.f32 %v562_v3, 0.0  ;;  %v1146_v3 = vld [vmem:[%s1498_s11] sm:$0xff]  }
 0x2b2   :  { %v627_v9 = vmax.f32 %v573_v5, 0.0  ;;  %1119 = vmatprep.mubr.msk.bf16.mxu0 %vm502_vm3, %v1146_v3  ;;  %v672_v5 = vpop.permute.xlu1 %671 }
 0x2b3   :  { %v625_v12 = vmax.f32 %v565_v7, 0.0 }
 0x2b4   :  { %v649_v13 = vpack.c.bf16 %v627_v9, %v626_v8  ;;  %v677_v6 = vpop.permute.xlu0 %676 }
 0x2b5   :  { %v648_v15 = vpack.c.bf16 %v625_v12, %v624_v11  ;;  %v1077_v16 = vpop.f32.mrb[8].mxu0 }
 0x2b6   :  { %v586_v17 = vadd.f32 %v1077_v16, %v415_v62  ;;  %v577_v18 = vpop.f32.mrb[9].mxu0  ;;  %v682_v7 = vpop.permute.xlu1 %681 }
 0x2b7   :  { %v578_v19 = vadd.f32 %v577_v18, %v405_v60  ;;  %v1078_v20 = vpop.f32.mrb[10].mxu0  ;;  %1087 = vmatprep.subr.bf16.mxu1 %v648_v15 }
 0x2b8   :  { %v589_v21 = vadd.f32 %v1078_v20, %v420_v2  ;;  %v580_v22 = vpop.f32.mrb[11].mxu0  ;;  %1088 = vmatpush3.bf16.msra.mxu1 %v648_v15  ;;  %v630_v25 = vmax.f32 %v586_v17, 0.0  ;;  %v1145_v2 = vld [vmem:[%s1496_s9 + $0x18] sm:$0xff]   ;;  %v687_v11 = vpop.permute.xlu0 %686 }
 0x2b9   :  { %v581_v24 = vadd.f32 %v580_v22, %v410_v61  ;;  %1089 = vmatprep.subr.bf16.mxu1 %v649_v13  ;;  %v628_v28 = vmax.f32 %v578_v19, 0.0 }
 0x2ba   :  { %v631_v26 = vmax.f32 %v589_v21, 0.0  ;;  %v692_v16 = vpop.permute.xlu1 %691 }
 0x2bb   :  { %v629_v29 = vmax.f32 %v581_v24, 0.0 }
 0x2bc   :  { %v651_v30 = vpack.c.bf16 %v631_v26, %v630_v25  ;;  %1090 = vmatpush3.bf16.msra.mxu1 %v649_v13 }
 0x2bd   :  { %v650_v31 = vpack.c.bf16 %v629_v29, %v628_v28  ;;  %v1081_v32 = vpop.f32.mrb[12].mxu0 }
 0x2be   :  { %v602_v33 = vadd.f32 %v1081_v32, %v435_v23  ;;  %v593_v34 = vpop.f32.mrb[13].mxu0  ;;  %v697_v23 = vpop.permute.xlu0 %696 }
 0x2bf   :  { %v594_v36 = vadd.f32 %v593_v34, %v425_v10  ;;  %v1082_v37 = vpop.f32.mrb[14].mxu0  ;;  %1091 = vmatprep.subr.bf16.mxu1 %v650_v31  ;;  %v702_v28 = vpop.permute.xlu1 %701 }
 0x2c0   :  { %v605_v38 = vadd.f32 %v1082_v37, %v440_v27  ;;  %v596_v39 = vpop.f32.mrb[15].mxu0  ;;  %1092 = vmatpush3.bf16.msra.mxu1 %v650_v31  ;;  %v634_v42 = vmax.f32 %v602_v33, 0.0 }
 0x2c1   :  { %v597_v41 = vadd.f32 %v596_v39, %v430_v14  ;;  %1093 = vmatprep.subr.bf16.mxu1 %v651_v30  ;;  %v632_v44 = vmax.f32 %v594_v36, 0.0 }
 0x2c2   :  { %v635_v43 = vmax.f32 %v605_v38, 0.0 }
 0x2c3   :  { %v633_v45 = vmax.f32 %v597_v41, 0.0  ;;  %v821_v41 = vpop.permute.xlu1 %820 }
 0x2c4   :  { %v653_v46 = vpack.c.bf16 %v635_v43, %v634_v42  ;;  %1094 = vmatpush3.bf16.msra.mxu1 %v651_v30  ;;  %v816_v42 = vpop.permute.xlu0 %815 }
 0x2c5   :  { %v652_v48 = vpack.c.bf16 %v633_v45, %v632_v44  ;;  %v1085_v49 = vpop.f32.mrb[16].mxu0 }
 0x2c6   :  { %v618_v50 = vadd.f32 %v1085_v49, %v455_v47  ;;  %v609_v51 = vpop.f32.mrb[17].mxu0  ;;  %v1003_v49 = vld [vmem:[%s1487_s0] sm:$0xff]   ;;  %s1173_s0 = smov [#allocation3]  }
 0x2c7   :  { %v610_v53 = vadd.f32 %v609_v51, %v445_v35  ;;  %v1086_v54 = vpop.f32.mrb[18].mxu0  ;;  %1095 = vmatprep.subr.bf16.mxu1 %v652_v48  ;;  %v831_v43 = vpop.permute.xlu1 %830  ;;  %v1004_v51 = vunpack.c.l.bf16 %v1003_v49 }
 0x2c8   :  { %v621_v55 = vadd.f32 %v1086_v54, %v460_v52  ;;  %v612_v56 = vpop.f32.mrb[19].mxu0  ;;  %1096 = vmatpush3.bf16.msra.mxu1 %v652_v48  ;;  %v638_v58 = vmax.f32 %v618_v50, 0.0  ;;  %v826_v44 = vpop.permute.xlu0 %825  ;;  %v1005_v50 = vunpack.c.h.bf16 %v1003_v49 }
 0x2c9   :  { %v613_v57 = vadd.f32 %v612_v56, %v450_v40  ;;  %1097 = vmatprep.subr.bf16.mxu1 %v653_v46  ;;  %v636_v60 = vmax.f32 %v610_v53, 0.0  ;;  %v1147_v40 = vld [vmem:[%s1498_s11 + $0x8] sm:$0xff]   ;;  %s958_s11 = sshll.u32 %s1173_s0, 4  ;;  %s959_s11 = int_to_ptr.vmem [resolvable:$true] %s958_s11 }
 0x2ca   :  { %v639_v59 = vmax.f32 %v621_v55, 0.0  ;;  %s1148_s5 = scalar_lea.vmem %s959_s11, 16  ;;  %s1152_s4 = scalar_lea.vmem %s959_s11, 32 }
 0x2cb   :  { %v637_v61 = vmax.f32 %v613_v57, 0.0  ;;  %v914_v45 = vpop.permute.xlu1 %913  ;;  %p1149_p0 = scmp.ne.s32.totalorder %s959_s11, %s1148_s5  ;;  %p1153_p1 = scmp.lt.s32.totalorder %s959_s11, %s959_s11 }
 0x2cc   :  { %v655_v62 = vpack.c.bf16 %v639_v59, %v638_v58  ;;  %1098 = vmatpush3.bf16.msra.mxu1 %v653_v46  ;;  %v909_v46 = vpop.permute.xlu0 %908  ;;  %p1154_p2 = scmp.lt.s32.totalorder %s1152_s4, %s1148_s5 }
 0x2cd   :  { %v654_v63 = vpack.c.bf16 %v637_v61, %v636_v60 }
 0x2ce   :  { %p1155_p3 = por %p1154_p2, %p1153_p1 }
 0x2cf   :  { %1099 = vmatprep.subr.bf16.mxu1 %v654_v63  ;;  %v924_v47 = vpop.permute.xlu1 %923 }
 0x2d0   :  { %1100 = vmatpush3.bf16.msra.mxu1 %v654_v63  ;;  %v919_v48 = vpop.permute.xlu0 %918  ;;  %p1156_p4 = pnand %p1155_p3, %p1149_p0 }
 0x2d1   :  { %1101 = vmatprep.subr.bf16.mxu1 %v655_v62 }
 0x2d3   :  { %v68_v52 = vpop.permute.xlu1 %67 }
 0x2d4   :  { %1102 = vmatpush3.bf16.msra.mxu1 %v655_v62  ;;  %v63_v53 = vpop.permute.xlu0 %62  ;;  %v71_v54 = vmul.f32 %v1005_v50, %v68_v52 }
 0x2d5   :  { %v70_v55 = vmul.f32 %v1004_v51, %v63_v53 }
 0x2d7   :  { %1104 = vmatmul.mubr.bf16.vlgmr.msra.gmra.mrb[8].mxu1 %v1143_v0  ;;  %v72_v62 = vadd.f32 %v71_v54, %v70_v55 }
 0x2d8   :  { %1107 = vmatprep.mubr.bf16.mxu1 %v1144_v1 }
 0x2df   :  { %1108 = vmatmul.mubr.bf16.gmra.mrb[12].mxu1 %v1145_v2 }
 0x3aa   :  { %v1105_v8 = vpop.f32.mrb[8].mxu1 }
 0x3ab   :  { %v771_v9 = vadd.f32 %v1105_v8, %v677_v6  ;;  %v762_v10 = vpop.f32.mrb[9].mxu1 }
 0x3ac   :  { %v763_v12 = vadd.f32 %v762_v10, %v667_v4  ;;  %v1106_v13 = vpop.f32.mrb[10].mxu1  ;;  %v73_v4 = vrot.slane %v72_v62, 4 }
 0x3ad   :  { %v774_v14 = vadd.f32 %v1106_v13, %v682_v7  ;;  %v765_v15 = vpop.f32.mrb[11].mxu1  ;;  %v795_v18 = vmax.f32 %v771_v9, 0.0  ;;  %v945_v13 = vlaneseq }
 0x3ae   :  { %v766_v17 = vadd.f32 %v765_v15, %v672_v5  ;;  %v793_v20 = vmax.f32 %v763_v12, 0.0  ;;  %v74_v10 = vadd.f32 %v73_v4, %v72_v62 }
 0x3af   :  { %v796_v19 = vmax.f32 %v774_v14, 0.0 }
 0x3b0   :  { %v794_v21 = vmax.f32 %v766_v17, 0.0  ;;  %v75_v15 = vrot.slane %v74_v10, 2  ;;  %v946_v17 = vshrl.u32 %v945_v13, 7 }
 0x3b1   :  { %v806_v22 = vpack.c.bf16 %v796_v19, %v795_v18 }
 0x3b2   :  { %v805_v24 = vpack.c.bf16 %v794_v21, %v793_v20  ;;  %v1109_v25 = vpop.f32.mrb[12].mxu1  ;;  %v76_v19 = vadd.f32 %v75_v15, %v74_v10  ;;  %v947_v21 = vsub.s32 0, %v946_v17 }
 0x3b3   :  { %v787_v26 = vadd.f32 %v1109_v25, %v697_v23  ;;  %v778_v27 = vpop.f32.mrb[13].mxu1  ;;  %v943_v23 = vpop.permute.xlu0 %942 }
 0x3b4   :  { %v779_v29 = vadd.f32 %v778_v27, %v687_v11  ;;  %v1110_v30 = vpop.f32.mrb[14].mxu1  ;;  %1111 = vmatprep.subr.bf16.mxu0 %v805_v24 }
 0x3b5   :  { %v790_v31 = vadd.f32 %v1110_v30, %v702_v28  ;;  %v781_v32 = vpop.f32.mrb[15].mxu1  ;;  %1112 = vmatpush3.bf16.msra.mxu0 %v805_v24  ;;  %v799_v34 = vmax.f32 %v787_v26, 0.0  ;;  %v77_v24 = vrot.slane %v76_v19, 1  ;;  %v948_v26 = vrot.slane %v943_v23, %v947_v21 }
 0x3b6   :  { %v782_v33 = vadd.f32 %v781_v32, %v692_v16  ;;  %1113 = vmatprep.subr.bf16.mxu0 %v806_v22  ;;  %v797_v36 = vmax.f32 %v779_v29, 0.0 }
 0x3b7   :  { %v800_v35 = vmax.f32 %v790_v31, 0.0  ;;  %v78_v28 = vadd.f32 %v77_v24, %v76_v19 }
 0x3b8   :  { %v798_v37 = vmax.f32 %v782_v33, 0.0 }
 0x3b9   :  { %v808_v38 = vpack.c.bf16 %v800_v35, %v799_v34  ;;  %1114 = vmatpush3.bf16.msra.mxu0 %v806_v22 }
 0x3ba   :  { %v807_v39 = vpack.c.bf16 %v798_v37, %v797_v36 }
 0x3bc   :  { %1115 = vmatprep.subr.bf16.mxu0 %v807_v39 }
 0x3bd   :  { %1116 = vmatpush3.bf16.msra.mxu0 %v807_v39 }
 0x3be   :  { %1117 = vmatprep.subr.bf16.mxu0 %v808_v38 }
 0x3c1   :  { %1118 = vmatpush3.bf16.msra.mxu0 %v808_v38 }
 0x3c4   :  { %1120 = vmatmul.mubr.msk.bf16.vlgmr.msra.gmra.mrb[20].mxu0 %vm502_vm3, %v1147_v40 }
 0x497   :  { %v1121_v56 = vpop.f32.mrb[20].mxu0 }
 0x498   :  { %v883_v57 = vpop.f32.mrb[21].mxu0  ;;  %v892_v58 = vadd.f32 %v1121_v56, %v826_v44 }
 0x499   :  { %v884_v59 = vadd.f32 %v883_v57, %v816_v42  ;;  %v1122_v60 = vpop.f32.mrb[22].mxu0 }
 0x49a   :  { %v886_v61 = vpop.f32.mrb[23].mxu0  ;;  %v895_v0 = vadd.f32 %v1122_v60, %v831_v43  ;;  %v900_v2 = vmax.f32 %v892_v58, 0.0 }
 0x49b   :  { %v898_v63 = vmax.f32 %v884_v59, 0.0  ;;  %v887_v1 = vadd.f32 %v886_v61, %v821_v41 }
 0x49c   :  { %v901_v6 = vmax.f32 %v895_v0, 0.0  ;;  %v928_v8 = vmul.f32 %v919_v48, %v900_v2 }
 0x49d   :  { %v899_v3 = vmax.f32 %v887_v1, 0.0  ;;  %v926_v5 = vmul.f32 %v909_v46, %v898_v63 }
 0x49e   :  { %v929_v11 = vmul.f32 %v924_v47, %v901_v6 }
 0x49f   :  { %v927_v7 = vmul.f32 %v914_v45, %v899_v3 }
 0x4a1   :  { %v930_v9 = vadd.f32 %v927_v7, %v926_v5 }
 0x4a3   :  { %v931_v12 = vadd.f32 %v930_v9, %v928_v8 }
 0x4a5   :  { %v932_v14 = vadd.f32 %v931_v12, %v929_v11 }
 0x4a7   :  { %v933_v16 = vrot.slane %v932_v14, 4 }
 0x4a9   :  { %v934_v18 = vadd.f32 %v933_v16, %v932_v14 }
 0x4ab   :  { %v935_v20 = vrot.slane %v934_v18, 2 }
 0x4ad   :  { %v936_v22 = vadd.f32 %v935_v20, %v934_v18 }
 0x4af   :  { %v937_v25 = vrot.slane %v936_v22, 1 }
 0x4b1   :  { %v938_v27 = vadd.f32 %v937_v25, %v936_v22 }
 0x4b3   :  { %v949_v29 = vadd.f32 %v948_v26, %v938_v27 }
 0x4b5   :  { %v950_v30 = vadd.f32 %v949_v29, %v78_v28 }
 0x4b7   :  { %951 = vst [vmem:[#allocation3] sm:$0x1] %v950_v30 }
 0x4b8   :  { %1159 = shalt.err (!%p1156_p4)
}
 0x4b9   :  { %s1160_s10 = scalar_lea.hbm %s1502_s15, 16 }
 0x4ba   :  { %p1161_p5 = scmp.ne.s32.totalorder %s1502_s15, %s1160_s10  ;;  %p1164_p6 = scmp.lt.u32.totalorder %s1160_s10, %s1502_s15 }
 0x4bc   :  { %p1166_p7 = pnand %p1164_p6, %p1161_p5 }
 0x4be   :  { %1169 = shalt.err (!%p1166_p7)
}
 0x4bf   :  { %961 = dma.vmem_to_hbm [thread:$0]  %s959_s11, 16, %s1502_s15, [#allocation4]  }
 0x4c0   :  { %1170 = dma.done.wait [#allocation4], 16  }
 0x4c1   :  { %1171 = vsyncadd [#allocation4], 4294967280 }
 0x4c2   :  { %965 = vsyncpa [#allocation4], 1 }

</bundles_post_ra>
